<compile_context>
chip_gen: v6e
topology: v6e:2x2x1
jax: 0.10.0
libtpu: 0.0.40
codegen_flags: <defaults>
</compile_context>

<pallas_src>
import functools
import math

import numpy as np
import jax
import jax.numpy as jnp
from jax.experimental import pallas as pl
from jax.experimental.pallas import tpu as pltpu

GRAY_R, GRAY_G, GRAY_B = 0.2989, 0.587, 0.114      # torchvision Grayscale(3) coeffs
GRAY_SUM = GRAY_R + GRAY_G + GRAY_B
ROTATION_FILL = (1.0, 1.0, 1.0)                    # module hardcodes rotation_fill=[1,1,1]


# ----------------------------------------------------------------------------
# Host-side construction of the per-cutout linear operators (glue / "params")
# ----------------------------------------------------------------------------
def _adaptive_bins(in_size, out_size):
    starts = [(o * in_size) // out_size for o in range(out_size)]
    ends = [-((-(o + 1) * in_size) // out_size) for o in range(out_size)]  # ceil
    return starts, ends


def _crop_pool_weights(H, W, cs, offy, offx, size_y, size_x):
    """input[:, :, offy:offy+size_y, offx:offx+size_x] -> adaptive_avg_pool2d(cs)."""
    P = cs * cs
    Wmat = np.zeros((P, H * W), np.float32)
    ys, ye = _adaptive_bins(size_y, cs)
    xs, xe = _adaptive_bins(size_x, cs)
    for a in range(cs):
        for b in range(cs):
            cnt = float((ye[a] - ys[a]) * (xe[b] - xs[b]))
            for y in range(ys[a], ye[a]):
                for x in range(xs[b], xe[b]):
                    Wmat[a * cs + b, (offy + y) * W + (offx + x)] += 1.0 / cnt
    return Wmat, np.zeros((P,), np.float32)


def _rotate_pool_weights(H, W, cs, angle_deg):
    """TF.rotate(angle, expand=True, fill) with NEAREST, then adaptive_avg_pool2d(cs)."""
    # TODO(synk): matches torchvision rotate(expand=True, NEAREST) semantics up to
    # sub-pixel rounding conventions of grid_sample; boundary pixels may differ.
    theta = math.radians(angle_deg)
    c, s = math.cos(theta), math.sin(theta)
    new_w = int(math.ceil(abs(W * c) + abs(H * s)))
    new_h = int(math.ceil(abs(H * c) + abs(W * s)))
    P = cs * cs
    Wmat = np.zeros((P, H * W), np.float32)
    fillw = np.zeros((P,), np.float32)
    ys, ye = _adaptive_bins(new_h, cs)
    xs, xe = _adaptive_bins(new_w, cs)
    for a in range(cs):
        for b in range(cs):
            cnt = float((ye[a] - ys[a]) * (xe[b] - xs[b]))
            p = a * cs + b
            for ei in range(ys[a], ye[a]):
                for ej in range(xs[b], xe[b]):
                    xo = (ej + 0.5) - new_w * 0.5
                    yo = (ei + 0.5) - new_h * 0.5
                    xi = c * xo + s * yo          # inverse rotation (output -> input)
                    yi = -s * xo + c * yo
                    sx = int(math.floor(xi + W * 0.5))   # nearest neighbour
                    sy = int(math.floor(yi + H * 0.5))
                    if 0 <= sx < W and 0 <= sy < H:
                        Wmat[p, sy * W + sx] += 1.0 / cnt
                    else:
                        fillw[p] += 1.0 / cnt
    return Wmat, fillw


def _build_cutout_params(H, W, cut_size, cutn, cut_pow, cutn_bw_portion, seed=0):
    """Deterministic synthetic randomness (numpy) -> pooling mats, fill weights, gray flags."""
    rng = np.random.RandomState(seed)
    max_size = min(H, W)
    min_size = min(H, W, cut_size)
    if cutn == 1:
        Wm, fw = _crop_pool_weights(H, W, cut_size, 0, 0, H, W)
        return np.stack([Wm]), np.stack([fw]), np.array([0], np.int32)
    cut_1 = round(cutn * (1 - cutn_bw_portion))
    cut_2 = cutn - cut_1
    w_list, f_list, g_list = [], [], []
    for i in range(cut_1):
        size = int(rng.rand() ** cut_pow * (max_size - min_size) + min_size)
        offsetx = int(rng.randint(0, W - size + 1))
        offsety = int(rng.randint(0, H - size + 1))
        Wm, fw = _crop_pool_weights(H, W, cut_size, offsety, offsetx, size, size)
        w_list.append(Wm)
        f_list.append(fw)
        g_list.append(1 if i < int(cutn_bw_portion * cut_1) else 0)
    for i in range(cut_2):
        angle = float(rng.uniform(-10.0, 10.0))
        Wm, fw = _rotate_pool_weights(H, W, cut_size, angle)
        w_list.append(Wm)
        f_list.append(fw)
        g_list.append(1 if i < int(cutn_bw_portion * cut_2) else 0)
    return np.stack(w_list), np.stack(f_list), np.array(g_list, np.int32)


# ----------------------------------------------------------------------------
# Pallas kernel: tiled  Y = X @ Wt + fill_col * fillw  (output block = accumulator)
# ----------------------------------------------------------------------------
def _cutouts_kernel(x_ref, w_ref, fw_ref, o_ref, *, n_color_rows, gray_fill):
    k = pl.program_id(1)     # contraction (H*W) tile index — reduction axis, last in grid

    @pl.when(k == 0)
    def _init():
        # bias = outer(fill_col, fillw): colour rows get fill=1.0, luminance rows
        # get the grayscale-consistent fill (GRAY_R+GRAY_G+GRAY_B)*1.0.
        # Built from a tiny iota once per column tile -> no replicated bias DMA.
        row = jax.lax.broadcasted_iota(jnp.int32, o_ref.shape, 0)
        fill_col = jnp.where(row < n_color_rows, 1.0, gray_fill)
        o_ref[...] = fill_col * fw_ref[...]          # (R, tn) * (1, tn) broadcast

    # bf16 x bf16 -> f32 on the MXU (default precision, f32 accumulation into the
    # resident output block)
    o_ref[...] += jnp.dot(x_ref[...], w_ref[...],
                          preferred_element_type=jnp.float32)


def _pick_tile(total, cap):
    """Largest multiple of 128 that divides `total` and is <= cap, else full extent."""
    t = (min(cap, total) // 128) * 128
    while t >= 128:
        if total % t == 0:
            return t
        t -= 128
    return total


def make_cutouts(x_nchw, cut_size, cutn, cut_pow=1.0, cutn_whole_portion=0.0,
                 cutn_bw_portion=0.2, seed=0, *, tn_max=2048, tk_max=2048):
    """Forward pass of MakeCutouts. Output layout matches torch.cat(cutouts):
    (cutn*N, C, cut_size, cut_size).  tn_max/tk_max cap the output-column and
    contraction tiles; defaults keep the double-buffered Wt stream (2*tk*tn*2 B
    = 16 MiB) comfortably under the 32 MiB scoped-VMEM limit on every chip."""
    del cutn_whole_portion  # unused in the reference forward pass as well
    N, C, H, W = x_nchw.shape
    assert C == 3, "Grayscale(3) / rotation_fill assume 3 channels"
    assert tuple(ROTATION_FILL) == (1.0, 1.0, 1.0)
    P = cut_size * cut_size
    HW = H * W

    Wmats, fillws, grays = _build_cutout_params(
        H, W, cut_size, cutn, cut_pow, cutn_bw_portion, seed)
    n_cut = Wmats.shape[0]
    NC = n_cut * P                                    # flattened output columns

    # pooling operator, column-batched over cutouts; bf16 (dominant HBM stream)
    wt = jnp.asarray(np.transpose(Wmats, (2, 0, 1)).reshape(HW, NC), jnp.bfloat16)
    fillw = jnp.asarray(fillws.reshape(1, NC), jnp.float32)

    # x slab rows: [R*N | G*N | B*N | lum*N]  (channel-major rows, spatial on lanes)
    x = jnp.asarray(x_nchw, jnp.float32)
    color = jnp.transpose(x, (1, 0, 2, 3)).reshape(C * N, HW)
    lum = (GRAY_R * x[:, 0] + GRAY_G * x[:, 1] + GRAY_B * x[:, 2]).reshape(N, HW)
    x_slab = jnp.concatenate([color, lum], axis=0).astype(jnp.bfloat16)   # ((C+1)*N, HW)
    R = (C + 1) * N

    tn = _pick_tile(NC, tn_max)
    tk = _pick_tile(HW, tk_max)
    grid = (NC // tn, HW // tk)

    kernel = functools.partial(_cutouts_kernel,
                               n_color_rows=C * N, gray_fill=float(GRAY_SUM))

    # scheduler hint: one pass over Wt dominates bytes; 2*R*HW*NC flops on the MXU
    cost = pl.CostEstimate(
        flops=2 * R * HW * NC,
        transcendentals=0,
        bytes_accessed=(x_slab.size * 2 * (NC // tn)   # x slab re-streamed per column tile
                        + wt.size * 2                  # pooling operator, read once
                        + fillw.size * 4
                        + R * NC * 4))                 # f32 output writeback

    y = pl.pallas_call(
        kernel,
        out_shape=jax.ShapeDtypeStruct((R, NC), jnp.float32),
        grid_spec=pltpu.PrefetchScalarGridSpec(
            num_scalar_prefetch=0,
            grid=grid,                                     # (column tiles, K tiles)
            in_specs=[
                pl.BlockSpec((R, tk), lambda j, k: (0, k)),   # x slab (tiny)
                pl.BlockSpec((tk, tn), lambda j, k: (k, j)),  # pooling operator (streamed)
                pl.BlockSpec((1, tn), lambda j, k: (0, j)),   # fill weights (resident per j)
            ],
            out_specs=pl.BlockSpec((R, tn), lambda j, k: (0, j)),  # resident accumulator
        ),
        compiler_params=pltpu.CompilerParams(
            dimension_semantics=("parallel", "arbitrary"),
            vmem_limit_bytes=32 * 1024 * 1024),
        cost_estimate=cost,
    )(x_slab, wt, fillw)

    # per-cutout grayscale selection + back to torch.cat layout (cutn*N, C, cs, cs)
    y4 = y.reshape(C + 1, N, n_cut, P)
    gray_flags = jnp.asarray(grays, jnp.int32)
    sel = jnp.where(gray_flags[None, None, :, None] > 0, y4[C][None], y4[:C])  # (C,N,K,P)
    out = jnp.transpose(sel, (2, 1, 0, 3)).reshape(n_cut * N, C, cut_size, cut_size)
    return out


if __name__ == "__main__":
    N, C, H, W = 2, 3, 16, 16
    cut_size, cutn = 8, 8
    cut_pow, cutn_whole_portion, cutn_bw_portion = 0.5, 0.2, 0.2

    key = jax.random.PRNGKey(0)
    x = jax.random.uniform(key, (N, C, H, W), dtype=jnp.float32)

    # small tile caps so the demo exercises the multi-tile grid + K accumulation path
    out = make_cutouts(x, cut_size=cut_size, cutn=cutn, cut_pow=cut_pow,
                       cutn_whole_portion=cutn_whole_portion,
                       cutn_bw_portion=cutn_bw_portion, seed=0,
                       tn_max=256, tk_max=128)
    out = jax.block_until_ready(out)
    assert out.shape == (cutn * N, C, cut_size, cut_size), out.shape

    # numpy f32 reference of the same linearized cutout operators
    Wmats, fillws, grays = _build_cutout_params(
        H, W, cut_size, cutn, cut_pow, cutn_bw_portion, seed=0)
    fill = np.asarray(ROTATION_FILL, np.float32)
    x_np = np.asarray(x, np.float32).reshape(N, C, H * W)
    refs = []
    for k in range(len(grays)):
        pooled = np.einsum('pq,ncq->ncp', Wmats[k], x_np)
        pooled = pooled + fillws[k][None, None, :] * fill[None, :, None]
        if grays[k]:
            l = GRAY_R * pooled[:, 0] + GRAY_G * pooled[:, 1] + GRAY_B * pooled[:, 2]
            pooled = np.stack([l, l, l], axis=1)
        refs.append(pooled.reshape(N, C, cut_size, cut_size))
    ref = np.concatenate(refs, axis=0)

    # bf16 operands with f32 accumulation: per-element error bound ~2*2^-8 * |x| < 1e-2
    np.testing.assert_allclose(np.asarray(out), ref, rtol=2e-2, atol=2e-2)
    print("KERNEL_OK")
</pallas_src>

<mosaic_0001>
module attributes {stable_mosaic.version = 11 : i64} {
  func.func @_cutouts_kernel(%arg0: i32, %arg1: i32, %arg2: memref<8x128xbf16, #tpu.memory_space<vmem>>, %arg3: memref<128x256xbf16, #tpu.memory_space<vmem>>, %arg4: memref<1x256xf32, #tpu.memory_space<vmem>>, %arg5: memref<8x256xf32, #tpu.memory_space<vmem>>) attributes {dimension_semantics = [#tpu.dimension_semantics<parallel>, #tpu.dimension_semantics<arbitrary>], iteration_bounds = array<i64: 2, 2>, scalar_prefetch = 0 : i64, scratch_operands = 0 : i64, tpu.core_type = #tpu.core_type<tc>, window_params = [{transform_indices = @transform_0, window_bounds = array<i64: 8, 128>}, {transform_indices = @transform_1, window_bounds = array<i64: 128, 256>}, {transform_indices = @transform_2, window_bounds = array<i64: 1, 256>}, {transform_indices = @transform_3, window_bounds = array<i64: 8, 256>}]} {
    %c0_i32 = arith.constant 0 : i32
    %0 = arith.cmpi eq, %arg1, %c0_i32 : i32
    %1 = arith.extui %0 : i1 to i32
    %c0_i32_0 = arith.constant 0 : i32
    %2 = arith.cmpi ne, %1, %c0_i32_0 : i32
    scf.if %2 {
      %9 = tpu.iota {dimensions = array<i32: 0>} : vector<8x256xi32>
      %c6_i32 = arith.constant 6 : i32
      %10 = vector.broadcast %c6_i32 : i32 to vector<8x256xi32>
      %11 = arith.cmpi slt, %9, %10 : vector<8x256xi32>
      %cst_8 = arith.constant 1.000000e+00 : f32
      %cst_9 = arith.constant 0.999899983 : f32
      %12 = vector.broadcast %cst_8 : f32 to vector<8x256xf32>
      %13 = vector.broadcast %cst_9 : f32 to vector<8x256xf32>
      %14 = arith.select %11, %12, %13 : vector<8x256xi1>, vector<8x256xf32>
      %c0_10 = arith.constant 0 : index
      %c0_11 = arith.constant 0 : index
      %15 = vector.load %arg4[%c0_10, %c0_11] : memref<1x256xf32, #tpu.memory_space<vmem>>, vector<1x256xf32>
      %16 = vector.broadcast %15 : vector<1x256xf32> to vector<8x256xf32>
      %17 = arith.mulf %14, %16 : vector<8x256xf32>
      %c0_12 = arith.constant 0 : index
      %c0_13 = arith.constant 0 : index
      %18 = vector.load %arg5[%c0_12, %c0_13] : memref<8x256xf32, #tpu.memory_space<vmem>>, vector<8x256xf32>
      tpu.vector_store %arg5[%c0_12, %c0_13], %17 {strides = array<i32>} : memref<8x256xf32, #tpu.memory_space<vmem>>, vector<8x256xf32>,
    } else {
    }
    %c0 = arith.constant 0 : index
    %c0_1 = arith.constant 0 : index
    %3 = vector.load %arg5[%c0, %c0_1] : memref<8x256xf32, #tpu.memory_space<vmem>>, vector<8x256xf32>
    %c0_2 = arith.constant 0 : index
    %c0_3 = arith.constant 0 : index
    %4 = vector.load %arg2[%c0_2, %c0_3] : memref<8x128xbf16, #tpu.memory_space<vmem>>, vector<8x128xbf16>
    %c0_4 = arith.constant 0 : index
    %c0_5 = arith.constant 0 : index
    %5 = vector.load %arg3[%c0_4, %c0_5] : memref<128x256xbf16, #tpu.memory_space<vmem>>, vector<128x256xbf16>
    %cst = arith.constant dense<0.000000e+00> : vector<8x256xf32>
    %6 = tpu.matmul %4, %5, %cst {dimension_numbers = #tpu.dot_dimension_numbers<[1], [0], [0], [1], [0, 0, 1, 1], [], []>} : vector<8x128xbf16>, vector<128x256xbf16>, vector<8x256xf32> -> vector<8x256xf32>
    %7 = arith.addf %3, %6 : vector<8x256xf32>
    %c0_6 = arith.constant 0 : index
    %c0_7 = arith.constant 0 : index
    %8 = vector.load %arg5[%c0_6, %c0_7] : memref<8x256xf32, #tpu.memory_space<vmem>>, vector<8x256xf32>
    tpu.vector_store %arg5[%c0_6, %c0_7], %7 {strides = array<i32>} : memref<8x256xf32, #tpu.memory_space<vmem>>, vector<8x256xf32>,
    return
  }
  func.func @transform_0(%arg0: i32, %arg1: i32) -> (i32, i32) {
    %c0_i32 = arith.constant 0 : i32
    %c0_i32_0 = arith.constant 0 : i32
    return %c0_i32, %arg1 : i32, i32
  }
  func.func @transform_1(%arg0: i32, %arg1: i32) -> (i32, i32) {
    %c0_i32 = arith.constant 0 : i32
    return %arg1, %arg0 : i32, i32
  }
  func.func @transform_2(%arg0: i32, %arg1: i32) -> (i32, i32) {
    %c0_i32 = arith.constant 0 : i32
    %c0_i32_0 = arith.constant 0 : i32
    return %c0_i32, %arg0 : i32, i32
  }
  func.func @transform_3(%arg0: i32, %arg1: i32) -> (i32, i32) {
    %c0_i32 = arith.constant 0 : i32
    %c0_i32_0 = arith.constant 0 : i32
    return %c0_i32, %arg0 : i32, i32
  }
}

</mosaic_0001>

<bundles_post_ra>
// kernel: tpu_custom_call.1
= control target key start
LH: loop header
LB: loop body
LE: loop exit
PB: predicated region body
PF: predicated region fallthrough
CT: control target
= control target key end

     0   :  { %s1427_s0 = inlined_call_operand.hbm [shape: bf16[8,256], index: 0, kind: input, shape index: {}]   ;;  %s1428_s1 = inlined_call_operand.hbm [shape: bf16[256,512], index: 1, kind: input, shape index: {}]   ;;  %s1429_s2 = inlined_call_operand.hbm [shape: f32[1,512], index: 2, kind: input, shape index: {}]   ;;  %s1430_s3 = inlined_call_operand.hbm [shape: f32[8,512], index: 3, kind: output, shape index: {}]  }
   0x1   :  { %1436 = sst [smem:[#allocation19_spill]] %s1427_s0 }
   0x2   :  { %1437 = sst [smem:[#allocation20_spill]] %s1428_s1 }
   0x3   :  { %1438 = sst [smem:[#allocation21_spill]] %s1429_s2 }
   0x4   :  { %1439 = sst [smem:[#allocation22_spill]] %s1430_s3 }
   0x5   :  { %8 = vsyncpa [#allocation3], 0 }
   0x6   :  { %10 = vsyncpa [#allocation3 + $0x1], 0 }
   0x7   :  { %11 = vsyncpa [#allocation6], 0 }
   0x8   :  { %13 = vsyncpa [#allocation6 + $0x1], 0 }
   0x9   :  { %14 = vsyncpa [#allocation4], 0 }
   0xa   :  { %16 = vsyncpa [#allocation4 + $0x1], 0  ;;  %s1069_s12 = smov 0   ;;  %s1071_s13 = smov 0  }
   0xb   :  { %s1073_s14 = smov 0   ;;  %s1075_s15 = smov 0  }
   0xc   :  { %s1077_s16 = smov 0   ;;  %s1079_s17 = smov 0  }
   0xd   :  { %s1081_s18 = smov 0   ;;  %s1083_s19 = smov 0  }
   0xe   :  { %s1085_s20 = smov 0   ;;  %s1087_s21 = smov 0  }
   0xf   :  { %s1089_s22 = smov 0   ;;  %s1091_s23 = smov 0  }
  0x10   :  { %s1093_s24 = smov 0   ;;  %s1095_s25 = smov 0  }
  0x11 LB: > { %1440 = sst [smem:[#allocation13_spill]] %s986_s12  ;;  %s31_s26 = sadd.s32 1, %s1030_s23  ;;  %s1038_s25 = sphi %s1095_s25, %s22_s25   ;;  %s1034_s24 = sphi %s1093_s24, %s1483_s24   ;;  %s1030_s23 = sphi %s1091_s23, %s1482_s23   ;;  %s1026_s22 = sphi %s1089_s22, %s1481_s22   ;;  %s1022_s21 = sphi %s1087_s21, %s1480_s21   ;;  %s1018_s20 = sphi %s1085_s20, %s1479_s20   ;;  %s1014_s19 = sphi %s1083_s19, %s1478_s19   ;;  %s1010_s18 = sphi %s1081_s18, %s1477_s18   ;;  %s1006_s17 = sphi %s1079_s17, %s1476_s17   ;;  %s1002_s16 = sphi %s1077_s16, %s1475_s16   ;;  %s998_s15 = sphi %s1075_s15, %s1474_s15   ;;  %s994_s14 = sphi %s1073_s14, %s1473_s14   ;;  %s990_s13 = sphi %s1071_s13, %s1472_s13   ;;  %s986_s12 = sphi %s1069_s12, %s1469_s12  }
  0x12   : > { %1441 = sst [smem:[#allocation14_spill]] %s990_s13  ;;  %s34_s27 = sadd.s32 1, %s1034_s24 }
  0x13   : > { %1442 = sst [smem:[#allocation15_spill]] %s1022_s21  ;;  %p32_p0 = scmp.ge.s32.totalorder %s31_s26, 2 }
  0x14   : > { %1443 = sst [smem:[#allocation16_spill]] %s1026_s22  ;;  %p49_p1 = scmp.eq.s32.totalorder %s1038_s25, 0 }
  0x15   : > { %s69_s28 = sadd.s32 1, %s1006_s17  ;;  %p76_p2 = scmp.ne.s32.totalorder %s1006_s17, %s1002_s16 }
  0x16   : > { %s1485_s26 = smov (%p32_p0, %s31_s26), 0  ;;  %s1487_s27 = smov (!%p32_p0, %s34_s27), %s1034_s24 }
  0x17   : > { %1444 = sst [smem:[#allocation17_spill]] %s1485_s26  ;;  %s1150_s29 = ssub.s32 %s1030_s23, %s1485_s26 }
  0x18   : > { %p1154_p3 = por %p76_p2, %p49_p1  ;;  %p36_p4 = scmp.ge.s32.totalorder %s1487_s27, 2 }
  0x19   : > { %p82_p5 = scmp.ne.s32.totalorder %s1002_s16, %s998_s15  ;;  %p1435_p6 = scmp.lt.s32.totalorder %s1038_s25, 4 }
  0x1a   : > { %s1489_s27 = smov (%p36_p4, %s1487_s27), 0  ;;  %s598_s4 = sshll.u32 %s1030_s23, 6 }
  0x1b   : > { %1446 = sst [smem:[#allocation18_spill]] %s1489_s27  ;;  %s176_s5 = sand.u32 1, %s1038_s25  }
  0x1c   : > { %s1167_s6 = ssub.s32 %s1034_s24, %s1489_s27  ;;  %s178_s8 = sand.u32 1, %s1006_s17  }
  0x1d   : > { %s66_s7 = sor.u32 %s1167_s6, %s1150_s29  ;;  %s599_s9 = sshll.u32 %s178_s8, 7 }
  0x1e   : > { %p67_p7 = scmp.eq.s32.totalorder %s66_s7, 0  ;;  %s601_s10 = sshll.u32 %s1034_s24, 1 }
  0x1f   : > { %s187_s26 = sadd.s32 %s601_s10, %s598_s4  ;;  %s180_s3 = scalar_lea.vmem [#allocation5], %s599_s9 }
  0x20   : > { %s1174_s11 = scalar_select %p67_p7, %s1006_s17, %s69_s28  }
  0x21   : > { %s190_s22 = sshll.u32 %s180_s3, 4  ;;  %s603_s21 = sshll.u32 %s187_s26, 6  ;;  %s191_s22 = int_to_ptr.vmem [resolvable:$true] %s190_s22 }
  0x22   : > { %s1447_s1 = sld [smem:[#allocation20_spill]]  ;;  %p1185_p8 = pnand %p1435_p6, %p1154_p3 }
  0x23   : > { %s1189_s7 = scalar_lea.sflag [#allocation6], %s176_s5  ;;  %s815_s28 = scalar_lea.vmem %s191_s22, 2048 }
  0x24   : > { %p804_p9 = pneg %p1185_p8  ;;  %p816_p10 = scmp.ne.s32.totalorder %s191_s22, %s815_s28 }
  0x25   : > { %s1040_s3 = smov [#allocation5]  }
  0x26   : > { %p818_p11 = pnand %p816_p10, %p804_p9  ;;  %s820_s26 = sshll.u32 %s1040_s3, 4  ;;  %s821_s26 = int_to_ptr.vmem [resolvable:$false] %s820_s26 }
  0x27   : > { %s822_s2 = scalar_lea.vmem %s821_s26, 4096  ;;  %p823_p13 = scmp.lt.s32.totalorder %s191_s22, %s821_s26 }
  0x28   : > { %s189_s13 = scalar_lea.hbm %s1447_s1, %s603_s21  ;;  %p819_p12 = pneg %p818_p11 }
  0x29   : > { %p824_p0 = scmp.lt.s32.totalorder %s822_s2, %s815_s28 }
  0x2b   : > { %p825_p2 = por %p824_p0, %p823_p13 }
  0x2d   : > { %p826_p3 = pnand %p825_p2, %p819_p12 }
  0x2f   : > { %829 = shalt.err (!%p826_p3)
}
  0x30   : > { %s1041_s12 = smov 256   ;;  %s1042_s21 = smov 128  }
  0x31   : > { %s1043_s30 = smov 8   ;;  %p607_p4 = scmp.ge.s32.totalorder %s1038_s25, 1 }
  0x32   : > { %651 = dma.hbm_to_vmem [thread:$0]  (!%p1185_p8), %s189_s13, 2048, %s191_s22, %s1189_s7, %s1041_s12, %s1042_s21, %s1043_s30  }
  0x33   : > { %p217_p7 = scmp.lt.s32.totalorder %s1038_s25, 5  ;;  %s1203_s8 = sadd.s32 4294967295, %s1038_s25  }
  0x34   : > { %p39_p10 = scmp.eq.s32.totalorder %s1150_s29, 0  ;;  %s41_s9 = sadd.s32 1, %s1018_s20 }
  0x35   : > { %p1198_p9 = pnand %p607_p4, %p217_p7  ;;  %p48_p11 = scmp.ne.s32.totalorder %s1018_s20, %s1014_s19 }
  0x36   : > { %p54_p12 = scmp.ne.s32.totalorder %s1014_s19, %s1010_s18  ;;  %p55_p13 = scmp.eq.s32.totalorder %s1203_s8, 0 }
  0x37   : > { %s1212_s27 = scalar_select %p39_p10, %s1018_s20, %s41_s9  }
  0x38   : > { %p50_p8 = por %p49_p1, %p48_p11  ;;  %s158_s13 = sand.u32 1, %s1018_s20  }
  0x39   : > { %s1450_s0 = sld [smem:[#allocation19_spill]]  ;;  %p1225_p0 = por %p55_p13, %p54_p12 }
  0x3a   : > { %p1234_p2 = por %p82_p5, %p55_p13  ;;  %s597_s29 = sshll.u32 %s158_s13, 2 }
  0x3b   : > { %p1240_p3 = pnand %p1435_p6, %p50_p8  ;;  %s162_s2 = scalar_lea.vmem [#allocation2], %s597_s29 }
  0x3c   : > { %s159_s12 = scalar_lea.sflag [#allocation3], %s158_s13  ;;  %s1044_s15 = smov [#allocation2]  }
  0x3d   : > { %p832_p4 = pneg %p1240_p3  ;;  %s848_s30 = sshll.u32 %s1044_s15, 4  ;;  %s849_s30 = int_to_ptr.vmem [resolvable:$false] %s848_s30 }
  0x3e   : > { %s850_s9 = scalar_lea.vmem %s849_s30, 128 }
  0x3f   : > { %s167_s28 = scalar_lea.hbm %s1450_s0, %s598_s4  ;;  %s169_s4 = sshll.u32 %s162_s2, 4  ;;  %s170_s4 = int_to_ptr.vmem [resolvable:$true] %s169_s4 }
  0x40   : > { %s843_s21 = scalar_lea.vmem %s170_s4, 64  ;;  %p851_p11 = scmp.lt.s32.totalorder %s170_s4, %s849_s30 }
  0x41   : > { %p844_p7 = scmp.ne.s32.totalorder %s170_s4, %s843_s21  ;;  %p852_p12 = scmp.lt.s32.totalorder %s850_s9, %s843_s21 }
  0x43   : > { %p846_p10 = pnand %p844_p7, %p832_p4  ;;  %p853_p8 = por %p852_p12, %p851_p11 }
  0x45   : > { %p847_p5 = pneg %p846_p10 }
  0x47   : > { %p854_p6 = pnand %p853_p8, %p847_p5 }
  0x49   : > { %857 = shalt.err (!%p854_p6)
}
  0x4a   : > { %s1454_s13 = sld [smem:[#allocation14_spill]]  ;;  %s594_s10 = sadd.s32 4294967294, %s1038_s25  }
  0x4b   : > { %s1455_s22 = sld [smem:[#allocation13_spill]]  ;;  %p93_p4 = scmp.eq.s32.totalorder %s1167_s6, 0 }
  0x4c   : > { %648 = dma.hbm_to_vmem [thread:$0]  (!%p1240_p3), %s167_s28, 64, %s170_s4, %s159_s12  }
  0x4d   : > { %s95_s29 = sadd.s32 1, %s994_s14  ;;  %p132_p11 = scmp.eq.s32.totalorder %s1203_s8, 3 }
  0x4e   : > { %s1256_s26 = scalar_select %p93_p4, %s994_s14, %s95_s29  }
  0x4f   : > { %p138_p12 = scmp.eq.s32.totalorder %s594_s10, 3  ;;  %s202_s21 = sand.u32 1, %s994_s14  }
  0x50   : > { %p102_p6 = scmp.ne.s32.totalorder %s994_s14, %s1454_s13  ;;  %s635_s15 = sshll.u32 %s1034_s24, 5 }
  0x51   : > { %p108_p7 = scmp.ne.s32.totalorder %s1454_s13, %s1455_s22  ;;  %s604_s4 = sshll.u32 %s202_s21, 1 }
  0x52   : > { %p104_p10 = por %p102_p6, %p49_p1  ;;  %p1269_p3 = por %p132_p11, %p102_p6 }
  0x53   : > { %p1262_p5 = por %p108_p7, %p55_p13  ;;  %p1273_p8 = por %p138_p12, %p108_p7 }
  0x54   : > { %s1459_s9 = sld [smem:[#allocation21_spill]]  ;;  %p1460_p1 = scmp.lt.s32.totalorder %s1038_s25, 4 }
  0x55   : > { %s1458_s6 = scalar_select %p1273_p8, 1, 0 }
  0x56   : > { %p1282_p13 = pnand %p1460_p1, %p104_p10  ;;  %s204_s10 = scalar_lea.vmem [#allocation7], %s604_s4 }
  0x57   : > { %s212_s29 = sshll.u32 %s204_s10, 4  ;;  %s1045_s21 = smov [#allocation7]   ;;  %s213_s29 = int_to_ptr.vmem [resolvable:$true] %s212_s29 }
  0x58   : > { %p860_p4 = pneg %p1282_p13  ;;  %s871_s0 = scalar_lea.vmem %s213_s29, 32 }
  0x59   : > { %p872_p6 = scmp.ne.s32.totalorder %s213_s29, %s871_s0  ;;  %s876_s1 = sshll.u32 %s1045_s21, 4  ;;  %s877_s1 = int_to_ptr.vmem [resolvable:$false] %s876_s1 }
  0x5a   : > { %s210_s13 = scalar_lea.hbm %s1459_s9, %s635_s15  ;;  %s878_s12 = scalar_lea.vmem %s877_s1, 64 }
  0x5b   : > { %p874_p7 = pnand %p872_p6, %p860_p4  ;;  %p879_p12 = scmp.lt.s32.totalorder %s213_s29, %s877_s1 }
  0x5c   : > { %p880_p8 = scmp.lt.s32.totalorder %s878_s12, %s871_s0 }
  0x5d   : > { %p875_p11 = pneg %p874_p7 }
  0x5e   : > { %p881_p10 = por %p880_p8, %p879_p12 }
  0x60   : > { %p882_p1 = pnand %p881_p10, %p875_p11 }
  0x62   : > { %885 = shalt.err (!%p882_p1)
}
  0x63   : > { %654 = dma.hbm_to_vmem [thread:$0]  (!%p1282_p13), %s210_s13, 32, %s213_s29, %s1189_s7  }
  0x64   : > { %221 = sbr.rel (%p1198_p9) target bundleno = 388 (0x184), region = 32  ;;  %s223_s15 = sand.u32 (!%p1198_p9), 1, %s1014_s19  }
  0x65   : > { %s1294_s4 = sshll.u32 (!%p1198_p9), %s223_s15, 2  ;;  %s224_s30 = scalar_lea.sflag (!%p1198_p9), [#allocation3], %s223_s15 }
  0x66   : > { %s227_s9 = scalar_lea.vmem (!%p1198_p9), [#allocation2], %s1294_s4 }
  0x69   : > { %969 = dma.done.wait (%p1225_p0), %s224_s30, 64  }
  0x6a   : > { %971 = vsyncadd (%p1225_p0), %s224_s30, 4294967232  ;;  %s232_s0 = sand.u32 1, %s1203_s8   ;;  %s234_s1 = sand.u32 1, %s1002_s16  }
  0x6b   : > { %s609_s7 = sshll.u32 %s234_s1, 7  ;;  %s233_s5 = scalar_lea.sflag [#allocation6], %s232_s0 }
  0x6c   : > { %s1303_s13 = scalar_lea.vmem [#allocation5], %s609_s7 }
  0x6d   : > { %973 = dma.done.wait (%p1234_p2), %s233_s5, 2048  }
  0x6e   : > { %975 = vsyncadd (%p1234_p2), %s233_s5, 4294965248  ;;  %s1462_s22 = sld [smem:[#allocation14_spill]] }
  0x74   : > { %s1310_s10 = sand.u32 1, %s1462_s22  }
  0x75   : > { %s610_s3 = sshll.u32 %s1310_s10, 1 }
  0x76   : > { %s245_s29 = scalar_lea.vmem [#allocation7], %s610_s3 }
  0x77   : > { %977 = dma.done.wait (%p1262_p5), %s233_s5, 32  }
  0x78   : > { %979 = vsyncadd (%p1262_p5), %s233_s5, 4294967264  ;;  %s611_s8 = sshll.u32 %s1310_s10, 4  ;;  %s1463_s12 = sld [smem:[#allocation15_spill]] }
  0x79   : > { %s1318_s21 = scalar_lea.vmem [#allocation8], %s611_s8 }
  0x7e   : > { %p612_p9 = scmp.ne.s32.totalorder %s1463_s12, 0 }
  0x80   : > { %286 = sbr.rel (%p612_p9) target bundleno = 144 (0x90), region = 48 }
  0x85   : > { %v287_v0 = vlaneseq  ;;  %v291_v2 = vld [vmem:[%s245_s29] sm:$0x3]  ;;  %v1046_v5 = vmov 0.9999  }
  0x87   : > { %v288_v1 = vshrl.u32 %v287_v0, 7 }
  0x89   : > { %vm289_vm0 = vcmp.lt.s32.totalorder %v288_v1, 6  ;;  %v295_v3 = vsub.s32 0, %v288_v1  ;;  %v299_v4 = vsub.s32 1, %v288_v1 }
  0x8a   : > { %v290_v6 = vsel %vm289_vm0, 1.0, %v1046_v5 }
  0x8b   : > { %v296_v7 = vrot.slane %v291_v2, %v295_v3  ;;  %v300_v8 = vrot.slane %v291_v2, %v299_v4 }
  0x8d   : > { %v303_v9 = vmul.f32 %v296_v7, %v290_v6  ;;  %v304_v10 = vmul.f32 %v300_v8, %v290_v6 }
  0x8f   : > { %305 = vst [vmem:[%s1318_s21] sm:$0xff] %v303_v9  ;;  %306 = vst [vmem:[%s1318_s21 + $0x8] sm:$0xff] %v304_v10 }
  0x90 PF: > { %v778_v11 = vld [vmem:[%s1303_s13 + $0x74] ss:$8 sps:$4 sm:$0xff]   ;;  %v780_v12 = vld [vmem:[%s1303_s13 + $0x70] ss:$8 sps:$4 sm:$0xff]   ;;  %v1047_v13 = vmov 0   ;;  %s1464_s18 = sld [smem:[#allocation16_spill]] }
  0x91   : > { %438 = vmatprep.mubr.bf16.mxu0 %v1047_v13  ;;  %406 = vmatprep.subr.bf16.mxu0 %v778_v11  ;;  %v781_v14 = vld [vmem:[%s1303_s13 + $0x64] ss:$8 sps:$4 sm:$0xff]   ;;  %v783_v15 = vld [vmem:[%s1303_s13 + $0x60] ss:$8 sps:$4 sm:$0xff]   ;;  %v784_v16 = vld [vmem:[%s1303_s13 + $0x54] ss:$8 sps:$4 sm:$0xff]  }
  0x92   : > { %407 = vmatpush1.bf16.msra.mxu0 %v780_v12  ;;  %v786_v17 = vld [vmem:[%s1303_s13 + $0x50] ss:$8 sps:$4 sm:$0xff]   ;;  %v787_v18 = vld [vmem:[%s1303_s13 + $0x44] ss:$8 sps:$4 sm:$0xff]   ;;  %v789_v19 = vld [vmem:[%s1303_s13 + $0x40] ss:$8 sps:$4 sm:$0xff]  }
  0x93   : > { %408 = vmatprep.subr.bf16.mxu0 %v781_v14  ;;  %v790_v20 = vld [vmem:[%s1303_s13 + $0x34] ss:$8 sps:$4 sm:$0xff]   ;;  %v792_v21 = vld [vmem:[%s1303_s13 + $0x30] ss:$8 sps:$4 sm:$0xff]   ;;  %v793_v22 = vld [vmem:[%s1303_s13 + $0x24] ss:$8 sps:$4 sm:$0xff]  }
  0x94   : > { %v795_v23 = vld [vmem:[%s1303_s13 + $0x20] ss:$8 sps:$4 sm:$0xff]   ;;  %v796_v24 = vld [vmem:[%s1303_s13 + $0x14] ss:$8 sps:$4 sm:$0xff]   ;;  %v798_v25 = vld [vmem:[%s1303_s13 + $0x10] ss:$8 sps:$4 sm:$0xff]  }
  0x95   : > { %v799_v26 = vld [vmem:[%s1303_s13 + $0x4] ss:$8 sps:$4 sm:$0xff]   ;;  %v801_v27 = vld [vmem:[%s1303_s13] ss:$8 sps:$4 sm:$0xff]   ;;  %v309_v28 = vld [vmem:[%s227_s9] sm:$0xf] }
  0x96   : > { %409 = vmatpush1.bf16.msra.mxu0 %v783_v15  ;;  %v307_v29 = vld [vmem:[%s1318_s21] sm:$0xff]  ;;  %v308_v31 = vld [vmem:[%s1318_s21 + $0x8] sm:$0xff]  ;;  %s636_s2 = sshll.u32 %s1464_s18, 8  ;;  %s466_s15 = sshll.u32 %s1318_s21, 4  ;;  %s1351_s15 = int_to_ptr.vmem [resolvable:$true] %s466_s15 }
  0x97   : > { %410 = vmatprep.subr.bf16.mxu0 %v784_v16  ;;  %s1465_s1 = sld [smem:[#allocation22_spill]]  ;;  %s452_s4 = scalar_lea.sflag [#allocation4], %s1310_s10 }
  0x98   : > { %s886_s9 = scalar_lea.vmem %s1351_s15, 256  ;;  %s1048_s5 = smov [#allocation8]  }
  0x99   : > { %p887_p0 = scmp.ne.s32.totalorder %s1351_s15, %s886_s9  ;;  %s890_s13 = sshll.u32 %s1048_s5, 4  ;;  %s891_s13 = int_to_ptr.vmem [resolvable:$false] %s890_s13 }
  0x9a   : > { %411 = vmatpush1.bf16.msra.mxu0 %v786_v17  ;;  %s892_s22 = scalar_lea.vmem %s891_s13, 512  ;;  %p893_p8 = scmp.lt.s32.totalorder %s1351_s15, %s891_s13 }
  0x9b   : > { %412 = vmatprep.subr.bf16.mxu0 %v787_v18  ;;  %p888_p2 = pnand %p887_p0, %p1269_p3  ;;  %p894_p13 = scmp.lt.s32.totalorder %s892_s22, %s886_s9 }
  0x9d   : > { %s1349_s7 = scalar_lea.hbm %s1465_s1, %s636_s2  ;;  %p889_p5 = pneg %p888_p2 }
  0x9e   : > { %413 = vmatpush1.bf16.msra.mxu0 %v789_v19  ;;  %p895_p4 = por %p894_p13, %p893_p8 }
  0x9f   : > { %414 = vmatprep.subr.bf16.mxu0 %v790_v20 }
  0xa0   : > { %p896_p6 = pnand %p895_p4, %p889_p5 }
  0xa2   : > { %415 = vmatpush1.bf16.msra.mxu0 %v792_v21 }
  0xa3   : > { %416 = vmatprep.subr.bf16.mxu0 %v793_v22 }
  0xa6   : > { %417 = vmatpush1.bf16.msra.mxu0 %v795_v23 }
  0xa7   : > { %418 = vmatprep.subr.bf16.mxu0 %v796_v24 }
  0xaa   : > { %419 = vmatpush1.bf16.msra.mxu0 %v798_v25 }
  0xab   : > { %420 = vmatprep.subr.bf16.mxu0 %v799_v26 }
  0xae   : > { %421 = vmatpush1.bf16.msra.mxu0 %v801_v27 }
  0xb1   : > { %439 = vmatmul.mubr.bf16.vlgmr.msra.gmra.mxu0 %v309_v28 }
 0x171   : > { %v440_v30 = vpop.f32.mrf.mxu0 }
 0x172   : > { %v447_v32 = vadd.f32 %v440_v30, %v307_v29 }
 0x173   : > { %v442_v33 = vpop.f32.mrf.mxu0 }
 0x174   : > { %449 = vst [vmem:[%s1318_s21] sm:$0xff] %v447_v32  ;;  %v448_v34 = vadd.f32 %v442_v33, %v308_v31 }
 0x175   : > { %v444_v35 = vpop.f32.mrf.mxu0 }
 0x176   : > { %450 = vst [vmem:[%s1318_s21 + $0x8] sm:$0xff] %v448_v34 }
 0x177   : > { %v445_v36 = vpop.f32.mrf.mxu0 }
 0x178   : > { %899 = shalt.err (!%p896_p6)
}
 0x179   : > { %s900_s3 = scalar_lea.hbm %s1349_s7, 256  ;;  %s904_s8 = scalar_lea.hbm %s1465_s1, 512 }
 0x17a   : > { %p901_p7 = scmp.ne.s32.totalorder %s1349_s7, %s900_s3  ;;  %p905_p10 = scmp.lt.s32.totalorder %s1349_s7, %s1465_s1 }
 0x17b   : > { %p906_p1 = scmp.lt.s32.totalorder %s904_s8, %s900_s3 }
 0x17c   : > { %p902_p11 = pnand %p901_p7, %p1269_p3 }
 0x17d   : > { %p907_p9 = por %p906_p1, %p905_p10 }
 0x17e   : > { %p903_p12 = pneg %p902_p11 }
 0x180   : > { %p908_p0 = pnand %p907_p9, %p903_p12 }
 0x182   : > { %911 = shalt.err (!%p908_p0)
}
 0x183   : > { %643 = dma.vmem_to_hbm [thread:$0]  (%p1269_p3), %s1351_s15, 256, %s1349_s7, %s452_s4  }
 0x184 PF: > { %s1466_s18 = sld [smem:[#allocation13_spill]]  ;;  %p660_p2 = scmp.ge.s32.totalorder %s1038_s25, 2 }
 0x185   : > { %p1467_p5 = scmp.ne.s32.totalorder %s1458_s6, 0 }
 0x187   : > { %p656_p8 = pnand %p660_p2, %p1467_p5 }
 0x189   : > { %p657_p13 = pneg %p656_p8 }
 0x18a   : > { %s478_s2 = sand.u32 1, %s1466_s18  }
 0x18b   : > { %s479_s30 = scalar_lea.sflag [#allocation4], %s478_s2 }
 0x18c   : > { %981 = dma.done.wait (%p657_p13), %s479_s30, 256  }
 0x18d   : > { %983 = vsyncadd (%p657_p13), %s479_s30, 4294967040  ;;  %s22_s25 = sadd.s32 1, %s1038_s25   ;;  %s1469_s12 = sld [smem:[#allocation14_spill]] }
 0x18e   : > { %p1380_p4 = scmp.ge.s32.totalorder %s22_s25, 6   ;;  %s1470_s28 = sld [smem:[#allocation17_spill]] }
 0x18f   : > { %s1471_s6 = sld [smem:[#allocation18_spill]]  ;;  %s1472_s13 = smov %s994_s14 }
 0x190   : > { %s1473_s14 = smov %s1256_s26  ;;  %s1474_s15 = smov %s1002_s16 }
 0x191   : > { %s1475_s16 = smov %s1006_s17  ;;  %s1476_s17 = smov %s1174_s11 }
 0x192   : > { %s1477_s18 = smov %s1014_s19  ;;  %s1478_s19 = smov %s1018_s20 }
 0x193   : > { %s1479_s20 = smov %s1212_s27  ;;  %s1480_s21 = smov %s1030_s23 }
 0x194   : > { %s1481_s22 = smov %s1034_s24  ;;  %s1482_s23 = smov %s1470_s28 }
 0x195   : > { %s1483_s24 = smov %s1471_s6  ;;  %21 = sbr.rel (!%p1380_p4) target bundleno = 17 (0x11), region = 105 }
 0x19a   :  { %484 = vsyncpa [#allocation3], 1 }
 0x19b   :  { %486 = vsyncpa [#allocation3 + $0x1], 1 }
 0x19c   :  { %487 = vsyncpa [#allocation6], 1 }
 0x19d   :  { %489 = vsyncpa [#allocation6 + $0x1], 1 }
 0x19e   :  { %490 = vsyncpa [#allocation4], 1 }
 0x19f   :  { %492 = vsyncpa [#allocation4 + $0x1], 1 }

</bundles_post_ra>
